<compile_context>
chip_gen: v7x
topology: tpu7x:2x2x1
jax: 0.10.0
libtpu: 0.0.40
codegen_flags: <defaults>
</compile_context>

<pallas_src>
import math

import jax
import jax.numpy as jnp
from jax.experimental import pallas as pl
from jax.experimental.pallas import tpu as pltpu

# ---------------- small synthetic config (mirrors InnerModelConfig) ----------------
STATE_DIM = 6
COND_CHANNELS = 32               # must be even (FourierFeatures)
HIDDEN_DIMS = [32, 32]
NUM_ACTIONS = 5
NUM_STEPS_CONDITIONING = 1       # act_emb output width == COND_CHANNELS
LEARNED_REWARD = True
BATCH = 8

NNO_DIM = STATE_DIM + int(LEARNED_REWARD)        # noisy_next_obs width (7)
IN_DIM = STATE_DIM * 2 + int(LEARNED_REWARD)     # cat([noisy, obs]) width (13)
OUT_DIM = STATE_DIM + int(LEARNED_REWARD)        # output width (7)

LANES = 128
TWO_PI = 2.0 * math.pi
MXU_DTYPE = jnp.bfloat16          # MXU operand dtype (f32 accumulation via preferred_element_type)

CC = COND_CHANNELS


def _pad_to(n, m):
    return ((n + m - 1) // m) * m


# ------------------------- static lane / row layout ---------------------------
# Packed activation input X (B, 128) f32:
#   lanes [0, CC)                       : zeros (noise_emb is generated in-kernel here)
#   lanes [ACT_LANE, ACT_LANE + A)      : act features (one-hot)
#   lanes [NNO_LANE, NNO_LANE + NNO)    : noisy_next_obs
#   lanes [OBS_LANE, OBS_LANE + S)      : obs
#   lane  C_LANE                        : c_noise   (outside both contraction windows)
ACT_LANE = CC                                    # 32
D1 = _pad_to(ACT_LANE + NUM_ACTIONS, 16)         # 48  (cond-layer contraction depth)
NNO_LANE = _pad_to(ACT_LANE + NUM_ACTIONS, 8)    # 40
OBS_LANE = NNO_LANE + NNO_DIM                    # 47
D0 = _pad_to(OBS_LANE + STATE_DIM, 16)           # 64  (MLP layer-0 contraction depth)
C_LANE = D0                                      # 64
assert C_LANE < LANES and D1 <= LANES and D0 <= LANES
assert NNO_LANE >= ACT_LANE + NUM_ACTIONS
assert max(HIDDEN_DIMS) <= LANES and CC <= LANES and OUT_DIM <= LANES


def _build_layout():
    """Static row offsets inside the bf16 weight slab and the small f32 slab."""
    nh = len(HIDDEN_DIMS)
    lay = {}
    cur = 0
    lay["W1_OFF"], lay["D1"] = cur, D1
    cur += D1
    lay["W0_OFF"], lay["D0"] = cur, D0
    cur += D0
    lay["WH"] = []
    for i in range(1, nh):
        rows = _pad_to(HIDDEN_DIMS[i - 1], 16)
        lay["WH"].append((cur, rows))
        cur += rows
    lay["WF_OFF"], lay["DF"] = cur, _pad_to(HIDDEN_DIMS[-1], 16)
    cur += lay["DF"]
    lay["W_ROWS"] = cur                                   # 176 for this config (16-row aligned)
    # f32 slab rows
    lay["FW2_ROW"], lay["PHASE_ROW"], lay["B1_ROW"], lay["B0_ROW"] = 0, 1, 2, 3
    lay["BH_ROWS"] = list(range(4, 4 + nh - 1))
    lay["BF_ROW"] = 4 + nh - 1
    lay["F_ROWS"] = _pad_to(lay["BF_ROW"] + 1, 8)
    return lay


def _silu(x):
    return x * jax.nn.sigmoid(x)


# --------------------------------- Pallas kernel -----------------------------------
def _make_kernel(lay):
    f32 = jnp.float32

    def mm(a, w):
        # w comes from the bf16 slab already; only the LHS activation is cast.
        return jnp.dot(a.astype(MXU_DTYPE), w, preferred_element_type=f32)

    def kernel(x_ref, w_ref, f_ref, out_ref):
        x = x_ref[...]                                   # (B, 128) f32 packed inputs
        f = f_ref[...]                                   # (F_ROWS, 128) f32 consts/biases
        c = x[:, C_LANE:C_LANE + 1]                      # (B, 1) noise level

        # Fourier features: cat([cos(g), sin(g)]) == sin(2*pi*c*fw2 + phase); padded lanes
        # give sin(0) = 0, so l1 = [noise_emb | act | (lanes killed by zero weight rows)].
        l1 = jnp.sin(TWO_PI * c * f[lay["FW2_ROW"]:lay["FW2_ROW"] + 1, :]
                     + f[lay["PHASE_ROW"]:lay["PHASE_ROW"] + 1, :]) + x

        # cond projection layer 1 with the action embedding folded into the same block:
        #   z = [noise_emb | act] @ [cp_w1 ; act_w @ cp_w1] + (act_b @ cp_w1 + cp_b1)
        z = mm(l1[:, :lay["D1"]], w_ref[lay["W1_OFF"]:lay["W1_OFF"] + lay["D1"], :]) \
            + f[lay["B1_ROW"]:lay["B1_ROW"] + 1, :]
        h = _silu(z)                                     # lanes >= CC are exactly 0

        # MLP layer 0 on cat([noisy, obs, cond]) as ONE matmul: lanes 0..CC-1 carry h with
        # cond_proj layer 2 folded into the weight rows; noisy/obs lanes hit their split of
        # mlp_w0; act lanes hit zero rows.  Bias row carries cp_b2 @ w0_cond + mlp_b0.
        l0 = h + x
        z = mm(l0[:, :lay["D0"]], w_ref[lay["W0_OFF"]:lay["W0_OFF"] + lay["D0"], :]) \
            + f[lay["B0_ROW"]:lay["B0_ROW"] + 1, :]
        y = _silu(z)

        # remaining hidden layers (Linear + SiLU)
        for (off, rows), brow in zip(lay["WH"], lay["BH_ROWS"]):
            z = mm(y[:, :rows], w_ref[off:off + rows, :]) + f[brow:brow + 1, :]
            y = _silu(z)

        # final projection (no activation); lanes >= OUT_DIM are exactly zero.
        z = mm(y[:, :lay["DF"]], w_ref[lay["WF_OFF"]:lay["WF_OFF"] + lay["DF"], :]) \
            + f[lay["BF_ROW"]:lay["BF_ROW"] + 1, :]
        out_ref[...] = z                                 # lane-dense (B, 128) store

    return kernel


# -------------------------------- parameter init -----------------------------------
def _linear_init(key, fan_in, fan_out):
    kw, kb = jax.random.split(key)
    bound = 1.0 / math.sqrt(fan_in)
    w = jax.random.uniform(kw, (fan_in, fan_out), jnp.float32, -bound, bound)
    b = jax.random.uniform(kb, (1, fan_out), jnp.float32, -bound, bound)
    return w, b


def init_params(key):
    """Raw (unfolded, unpacked) parameters — same structure as the PyTorch module."""
    nh = len(HIDDEN_DIMS)
    keys = jax.random.split(key, 6 + nh)
    params = {}
    params["fourier_w"] = jax.random.normal(keys[0], (1, CC // 2), jnp.float32)
    params["act_w"], params["act_b"] = _linear_init(
        keys[1], NUM_ACTIONS, CC // NUM_STEPS_CONDITIONING)
    params["cp_w1"], params["cp_b1"] = _linear_init(keys[2], CC, CC)
    params["cp_w2"], params["cp_b2"] = _linear_init(keys[3], CC, CC)
    prev = IN_DIM + CC
    params["mlp_w0"], params["mlp_b0"] = _linear_init(keys[4], prev, HIDDEN_DIMS[0])
    prev = HIDDEN_DIMS[0]
    for i, hdim in enumerate(HIDDEN_DIMS[1:], start=1):
        params[f"mlp_w{i}"], params[f"mlp_b{i}"] = _linear_init(keys[4 + i], prev, hdim)
        prev = hdim
    params["mlp_wf"], params["mlp_bf"] = _linear_init(keys[4 + nh], prev, OUT_DIM)
    return params


def pack_params(params):
    """Fold + pad + pack everything: bf16 weight slab + small f32 const/bias slab."""
    lay = _build_layout()

    wslab = jnp.zeros((lay["W_ROWS"], LANES), jnp.float32)
    fslab = jnp.zeros((lay["F_ROWS"], LANES), jnp.float32)

    # --- Fourier trick constants: cat([cos, sin]) == sin(arg + phase); stay f32 ---
    fw = params["fourier_w"][0]                                        # (CC//2,)
    fslab = fslab.at[lay["FW2_ROW"], :CC].set(jnp.concatenate([fw, fw]))
    fslab = fslab.at[lay["PHASE_ROW"], :CC // 2].set(
        jnp.full((CC // 2,), math.pi / 2.0, jnp.float32))

    # --- cond projection layer 1 block (act embedding folded, stacked under cp_w1) ---
    wslab = wslab.at[lay["W1_OFF"]:lay["W1_OFF"] + CC, :CC].set(params["cp_w1"])
    wslab = wslab.at[lay["W1_OFF"] + ACT_LANE:
                     lay["W1_OFF"] + ACT_LANE + NUM_ACTIONS, :CC].set(
        params["act_w"] @ params["cp_w1"])
    fslab = fslab.at[lay["B1_ROW"], :CC].set(
        (params["act_b"] @ params["cp_w1"] + params["cp_b1"])[0])

    # --- MLP layer 0 block: split mlp_w0 by source, fold cond_proj layer 2 into cond rows ---
    h0 = HIDDEN_DIMS[0]
    w0 = params["mlp_w0"]
    w0n, w0o, w0c = w0[:NNO_DIM], w0[NNO_DIM:IN_DIM], w0[IN_DIM:]
    wslab = wslab.at[lay["W0_OFF"]:lay["W0_OFF"] + CC, :h0].set(params["cp_w2"] @ w0c)
    wslab = wslab.at[lay["W0_OFF"] + NNO_LANE:
                     lay["W0_OFF"] + NNO_LANE + NNO_DIM, :h0].set(w0n)
    wslab = wslab.at[lay["W0_OFF"] + OBS_LANE:
                     lay["W0_OFF"] + OBS_LANE + STATE_DIM, :h0].set(w0o)
    fslab = fslab.at[lay["B0_ROW"], :h0].set(
        (params["cp_b2"] @ w0c + params["mlp_b0"])[0])

    # --- remaining hidden layers ---
    for i, ((off, _rows), brow) in enumerate(zip(lay["WH"], lay["BH_ROWS"]), start=1):
        w, b = params[f"mlp_w{i}"], params[f"mlp_b{i}"]
        wslab = wslab.at[off:off + w.shape[0], :w.shape[1]].set(w)
        fslab = fslab.at[brow, :w.shape[1]].set(b[0])

    # --- final projection ---
    wf, bf = params["mlp_wf"], params["mlp_bf"]
    wslab = wslab.at[lay["WF_OFF"]:lay["WF_OFF"] + wf.shape[0], :OUT_DIM].set(wf)
    fslab = fslab.at[lay["BF_ROW"], :OUT_DIM].set(bf[0])

    return wslab.astype(MXU_DTYPE), fslab, lay


# ----------------------------------- wrapper ----------------------------------------
def inner_model_forward(wslab, fslab, lay, noisy_next_obs, c_noise, obs, act):
    """noisy_next_obs: [B, NNO_DIM], c_noise: [B, 1], obs: [B, STATE_DIM],
       act: [B, NUM_ACTIONS] (one-hot / action features)  ->  [B, OUT_DIM]"""
    B = noisy_next_obs.shape[0]
    zeros = lambda n: jnp.zeros((B, n), jnp.float32)
    # single lane-dense (B, 128) input buffer; padding lanes are exactly zero.
    x = jnp.concatenate(
        [zeros(ACT_LANE), act.astype(jnp.float32),
         zeros(NNO_LANE - ACT_LANE - NUM_ACTIONS),
         noisy_next_obs.astype(jnp.float32), obs.astype(jnp.float32),
         zeros(C_LANE - OBS_LANE - STATE_DIM),
         c_noise.astype(jnp.float32),
         zeros(LANES - C_LANE - 1)], axis=1)

    kdepth = lay["D1"] + lay["D0"] + sum(r for _, r in lay["WH"]) + lay["DF"]
    flops = int(2 * B * kdepth * LANES)
    transcendentals = int((len(HIDDEN_DIMS) + 2) * B * LANES)   # sin + (nh+1) sigmoids
    bytes_accessed = int(wslab.size * 2 + fslab.size * 4 + x.size * 4 + B * LANES * 4)

    vmem = pl.BlockSpec(memory_space=pltpu.MemorySpace.VMEM)
    out = pl.pallas_call(
        _make_kernel(lay),
        out_shape=jax.ShapeDtypeStruct((B, LANES), jnp.float32),
        in_specs=[vmem, vmem, vmem],
        out_specs=vmem,
        cost_estimate=pl.CostEstimate(flops=flops, transcendentals=transcendentals,
                                      bytes_accessed=bytes_accessed),
    )(x, wslab, fslab)
    return out[:, :OUT_DIM]


# ---------------------------- pure-JAX reference (check) ----------------------------
def reference_forward(params, noisy_next_obs, c_noise, obs, act):
    """Exact f32, unfolded, unpacked reference of the PyTorch module's forward."""
    c = c_noise[:, 0]
    g = TWO_PI * c[:, None] * params["fourier_w"]
    noise_emb = jnp.concatenate([jnp.cos(g), jnp.sin(g)], axis=-1)
    act_emb = act @ params["act_w"] + params["act_b"]
    cond = noise_emb + act_emb
    cond = _silu(cond @ params["cp_w1"] + params["cp_b1"]) @ params["cp_w2"] + params["cp_b2"]
    x = jnp.concatenate([noisy_next_obs, obs, cond], axis=1)
    y = _silu(x @ params["mlp_w0"] + params["mlp_b0"])
    for i in range(1, len(HIDDEN_DIMS)):
        y = _silu(y @ params[f"mlp_w{i}"] + params[f"mlp_b{i}"])
    return y @ params["mlp_wf"] + params["mlp_bf"]


# -------------------------------------- main -----------------------------------------
if __name__ == "__main__":
    key = jax.random.PRNGKey(0)
    kp, k1, k2, k3, k4 = jax.random.split(key, 5)

    params = init_params(kp)
    wslab, fslab, lay = pack_params(params)

    noisy_next_obs = jax.random.normal(k1, (BATCH, NNO_DIM), jnp.float32)
    c_noise = jax.random.normal(k2, (BATCH, 1), jnp.float32)
    obs = jax.random.normal(k3, (BATCH, STATE_DIM), jnp.float32)
    # The module declares act: [B] but act_emb starts with nn.Linear(num_actions, ...), which
    # needs a feature dimension -> feed one-hot action features [B, num_actions].
    act = jax.nn.one_hot(jax.random.randint(k4, (BATCH,), 0, NUM_ACTIONS),
                         NUM_ACTIONS, dtype=jnp.float32)

    out = inner_model_forward(wslab, fslab, lay, noisy_next_obs, c_noise, obs, act)
    out = jax.block_until_ready(out)

    ref = reference_forward(params, noisy_next_obs, c_noise, obs, act)
    assert out.shape == (BATCH, OUT_DIM), out.shape
    # bf16 MXU operands / bf16-stored folded weights (f32 accumulation) -> relaxed tolerance.
    assert jnp.allclose(out, ref, atol=5e-2, rtol=5e-2), float(jnp.max(jnp.abs(out - ref)))

    print("KERNEL_OK")
</pallas_src>

<mosaic_0001>
module attributes {stable_mosaic.version = 11 : i64} {
  func.func @kernel(%arg0: memref<8x128xf32, #tpu.memory_space<vmem>>, %arg1: memref<176x128xbf16, #tpu.memory_space<vmem>>, %arg2: memref<8x128xf32, #tpu.memory_space<vmem>>, %arg3: memref<8x128xf32, #tpu.memory_space<vmem>>) attributes {dimension_semantics = [], scalar_prefetch = 0 : i64, scratch_operands = 0 : i64, tpu.core_type = #tpu.core_type<tc>} {
    %c0 = arith.constant 0 : index
    %c0_0 = arith.constant 0 : index
    %0 = vector.load %arg0[%c0, %c0_0] : memref<8x128xf32, #tpu.memory_space<vmem>>, vector<8x128xf32>
    %c0_1 = arith.constant 0 : index
    %c0_2 = arith.constant 0 : index
    %1 = vector.load %arg2[%c0_1, %c0_2] : memref<8x128xf32, #tpu.memory_space<vmem>>, vector<8x128xf32>
    %2 = vector.extract_strided_slice %0 {offsets = [0, 64], sizes = [8, 1], strides = [1, 1]} : vector<8x128xf32> to vector<8x1xf32>
    %cst = arith.constant 6.28318548 : f32
    %3 = vector.broadcast %cst : f32 to vector<8x1xf32>
    %4 = arith.mulf %3, %2 : vector<8x1xf32>
    %5 = vector.extract_strided_slice %1 {offsets = [0, 0], sizes = [1, 128], strides = [1, 1]} : vector<8x128xf32> to vector<1x128xf32>
    %6 = vector.broadcast %4 : vector<8x1xf32> to vector<8x128xf32>
    %7 = vector.broadcast %5 : vector<1x128xf32> to vector<8x128xf32>
    %8 = arith.mulf %6, %7 : vector<8x128xf32>
    %9 = vector.extract_strided_slice %1 {offsets = [1, 0], sizes = [1, 128], strides = [1, 1]} : vector<8x128xf32> to vector<1x128xf32>
    %10 = vector.broadcast %9 : vector<1x128xf32> to vector<8x128xf32>
    %11 = arith.addf %8, %10 : vector<8x128xf32>
    %12 = math.sin %11 : vector<8x128xf32>
    %13 = arith.addf %12, %0 : vector<8x128xf32>
    %14 = vector.extract_strided_slice %13 {offsets = [0, 0], sizes = [8, 48], strides = [1, 1]} : vector<8x128xf32> to vector<8x48xf32>
    %c0_3 = arith.constant 0 : index
    %c0_4 = arith.constant 0 : index
    %15 = vector.load %arg1[%c0_3, %c0_4] : memref<176x128xbf16, #tpu.memory_space<vmem>>, vector<48x128xbf16>
    %16 = arith.truncf %14 : vector<8x48xf32> to vector<8x48xbf16>
    %cst_5 = arith.constant dense<0.000000e+00> : vector<8x128xf32>
    %17 = tpu.matmul %16, %15, %cst_5 {dimension_numbers = #tpu.dot_dimension_numbers<[1], [0], [0], [1], [0, 0, 1, 1], [], []>} : vector<8x48xbf16>, vector<48x128xbf16>, vector<8x128xf32> -> vector<8x128xf32>
    %18 = vector.extract_strided_slice %1 {offsets = [2, 0], sizes = [1, 128], strides = [1, 1]} : vector<8x128xf32> to vector<1x128xf32>
    %19 = vector.broadcast %18 : vector<1x128xf32> to vector<8x128xf32>
    %20 = arith.addf %17, %19 : vector<8x128xf32>
    %21 = arith.negf %20 : vector<8x128xf32>
    %22 = math.exp %21 : vector<8x128xf32>
    %cst_6 = arith.constant 1.000000e+00 : f32
    %23 = vector.broadcast %cst_6 : f32 to vector<8x128xf32>
    %24 = arith.addf %23, %22 : vector<8x128xf32>
    %25 = arith.divf %23, %24 : vector<8x128xf32>
    %26 = arith.mulf %20, %25 : vector<8x128xf32>
    %27 = arith.addf %26, %0 : vector<8x128xf32>
    %28 = vector.extract_strided_slice %27 {offsets = [0, 0], sizes = [8, 64], strides = [1, 1]} : vector<8x128xf32> to vector<8x64xf32>
    %c48 = arith.constant 48 : index
    %c0_7 = arith.constant 0 : index
    %29 = vector.load %arg1[%c48, %c0_7] : memref<176x128xbf16, #tpu.memory_space<vmem>>, vector<64x128xbf16>
    %30 = arith.truncf %28 : vector<8x64xf32> to vector<8x64xbf16>
    %cst_8 = arith.constant dense<0.000000e+00> : vector<8x128xf32>
    %31 = tpu.matmul %30, %29, %cst_8 {dimension_numbers = #tpu.dot_dimension_numbers<[1], [0], [0], [1], [0, 0, 1, 1], [], []>} : vector<8x64xbf16>, vector<64x128xbf16>, vector<8x128xf32> -> vector<8x128xf32>
    %32 = vector.extract_strided_slice %1 {offsets = [3, 0], sizes = [1, 128], strides = [1, 1]} : vector<8x128xf32> to vector<1x128xf32>
    %33 = vector.broadcast %32 : vector<1x128xf32> to vector<8x128xf32>
    %34 = arith.addf %31, %33 : vector<8x128xf32>
    %35 = arith.negf %34 : vector<8x128xf32>
    %36 = math.exp %35 : vector<8x128xf32>
    %cst_9 = arith.constant 1.000000e+00 : f32
    %37 = vector.broadcast %cst_9 : f32 to vector<8x128xf32>
    %38 = arith.addf %37, %36 : vector<8x128xf32>
    %39 = arith.divf %37, %38 : vector<8x128xf32>
    %40 = arith.mulf %34, %39 : vector<8x128xf32>
    %41 = vector.extract_strided_slice %40 {offsets = [0, 0], sizes = [8, 32], strides = [1, 1]} : vector<8x128xf32> to vector<8x32xf32>
    %c112 = arith.constant 112 : index
    %c0_10 = arith.constant 0 : index
    %42 = vector.load %arg1[%c112, %c0_10] : memref<176x128xbf16, #tpu.memory_space<vmem>>, vector<32x128xbf16>
    %43 = arith.truncf %41 : vector<8x32xf32> to vector<8x32xbf16>
    %cst_11 = arith.constant dense<0.000000e+00> : vector<8x128xf32>
    %44 = tpu.matmul %43, %42, %cst_11 {dimension_numbers = #tpu.dot_dimension_numbers<[1], [0], [0], [1], [0, 0, 1, 1], [], []>} : vector<8x32xbf16>, vector<32x128xbf16>, vector<8x128xf32> -> vector<8x128xf32>
    %45 = vector.extract_strided_slice %1 {offsets = [4, 0], sizes = [1, 128], strides = [1, 1]} : vector<8x128xf32> to vector<1x128xf32>
    %46 = vector.broadcast %45 : vector<1x128xf32> to vector<8x128xf32>
    %47 = arith.addf %44, %46 : vector<8x128xf32>
    %48 = arith.negf %47 : vector<8x128xf32>
    %49 = math.exp %48 : vector<8x128xf32>
    %cst_12 = arith.constant 1.000000e+00 : f32
    %50 = vector.broadcast %cst_12 : f32 to vector<8x128xf32>
    %51 = arith.addf %50, %49 : vector<8x128xf32>
    %52 = arith.divf %50, %51 : vector<8x128xf32>
    %53 = arith.mulf %47, %52 : vector<8x128xf32>
    %54 = vector.extract_strided_slice %53 {offsets = [0, 0], sizes = [8, 32], strides = [1, 1]} : vector<8x128xf32> to vector<8x32xf32>
    %c144 = arith.constant 144 : index
    %c0_13 = arith.constant 0 : index
    %55 = vector.load %arg1[%c144, %c0_13] : memref<176x128xbf16, #tpu.memory_space<vmem>>, vector<32x128xbf16>
    %56 = arith.truncf %54 : vector<8x32xf32> to vector<8x32xbf16>
    %cst_14 = arith.constant dense<0.000000e+00> : vector<8x128xf32>
    %57 = tpu.matmul %56, %55, %cst_14 {dimension_numbers = #tpu.dot_dimension_numbers<[1], [0], [0], [1], [0, 0, 1, 1], [], []>} : vector<8x32xbf16>, vector<32x128xbf16>, vector<8x128xf32> -> vector<8x128xf32>
    %58 = vector.extract_strided_slice %1 {offsets = [5, 0], sizes = [1, 128], strides = [1, 1]} : vector<8x128xf32> to vector<1x128xf32>
    %59 = vector.broadcast %58 : vector<1x128xf32> to vector<8x128xf32>
    %60 = arith.addf %57, %59 : vector<8x128xf32>
    %c0_15 = arith.constant 0 : index
    %c0_16 = arith.constant 0 : index
    %61 = vector.load %arg3[%c0_15, %c0_16] : memref<8x128xf32, #tpu.memory_space<vmem>>, vector<8x128xf32>
    tpu.vector_store %arg3[%c0_15, %c0_16], %60 {strides = array<i32>} : memref<8x128xf32, #tpu.memory_space<vmem>>, vector<8x128xf32>,
    return
  }
}

</mosaic_0001>

<bundles_post_ra>
// kernel: tpu_custom_call.1
= control target key start
LH: loop header
LB: loop body
LE: loop exit
PB: predicated region body
PF: predicated region fallthrough
CT: control target
= control target key end

     0   :  { %8 = vsyncpa [#allocation3], 0  ;;  %s860_s0 = inlined_call_operand.hbm [shape: f32[8,128], index: 0, kind: input, shape index: {}]   ;;  %s861_s1 = inlined_call_operand.hbm [shape: bf16[176,128], index: 1, kind: input, shape index: {}]   ;;  %s862_s2 = inlined_call_operand.hbm [shape: f32[8,128], index: 2, kind: input, shape index: {}]   ;;  %s863_s3 = inlined_call_operand.hbm [shape: f32[8,128], index: 3, kind: output, shape index: {}]  }
   0x1   :  { %9 = vsyncpa [#allocation6], 0 }
   0x2   :  { %10 = vsyncpa [#allocation4], 0  ;;  %s714_s12 = smov [#allocation5]   ;;  %s620_s16 = scalar_lea.hbm %s861_s1, 1408 }
   0x3   :  { %s26_s13 = sshll.u32 %s714_s12, 4  ;;  %p621_p0 = scmp.ne.s32.totalorder %s861_s1, %s620_s16  ;;  %s27_s13 = int_to_ptr.vmem [resolvable:$true] %s26_s13 }
   0x4   :  { %p624_p1 = scmp.lt.u32.totalorder %s620_s16, %s861_s1 }
   0x6   :  { %p626_p2 = pnand %p624_p1, %p621_p0 }
   0x8   :  { %629 = shalt.err (!%p626_p2)
}
   0x9   :  { %s630_s21 = scalar_lea.vmem %s27_s13, 1408  ;;  %p635_p4 = scmp.lt.s32.totalorder %s27_s13, %s27_s13 }
   0xa   :  { %p631_p3 = scmp.ne.s32.totalorder %s27_s13, %s630_s21  ;;  %p636_p5 = scmp.lt.s32.totalorder %s630_s21, %s630_s21 }
   0xc   :  { %p637_p6 = por %p636_p5, %p635_p4 }
   0xe   :  { %p638_p7 = pnand %p637_p6, %p631_p3 }
  0x10   :  { %641 = shalt.err (!%p638_p7)
}
  0x11   :  { %s715_s22 = smov 64   ;;  %s716_s23 = smov 4  }
  0x12   :  { %32 = dma.hbm_to_vmem [thread:$0]  %s861_s1, 1408, %s27_s13, [#allocation6], %s715_s22, %s715_s22, %s716_s23  }
  0x13   :  { %s717_s26 = smov [#allocation2]   ;;  %s718_s28 = smov [#allocation7]  }
  0x14   :  { %s17_s27 = sshll.u32 %s717_s26, 4  ;;  %s39_s29 = sshll.u32 %s718_s28, 4  ;;  %s18_s27 = int_to_ptr.vmem [resolvable:$true] %s17_s27  ;;  %s40_s29 = int_to_ptr.vmem [resolvable:$true] %s39_s29 }
  0x15   :  { %s642_s5 = scalar_lea.hbm %s860_s0, 128 }
  0x16   :  { %p643_p8 = scmp.ne.s32.totalorder %s860_s0, %s642_s5  ;;  %p646_p9 = scmp.lt.u32.totalorder %s642_s5, %s860_s0 }
  0x18   :  { %p648_p10 = pnand %p646_p9, %p643_p8 }
  0x1a   :  { %651 = shalt.err (!%p648_p10)
}
  0x1b   :  { %s652_s1 = scalar_lea.vmem %s18_s27, 128  ;;  %p657_p12 = scmp.lt.s32.totalorder %s18_s27, %s18_s27 }
  0x1c   :  { %p653_p11 = scmp.ne.s32.totalorder %s18_s27, %s652_s1  ;;  %p658_p13 = scmp.lt.s32.totalorder %s652_s1, %s652_s1 }
  0x1e   :  { %p659_p0 = por %p658_p13, %p657_p12 }
  0x20   :  { %p660_p1 = pnand %p659_p0, %p653_p11 }
  0x22   :  { %663 = shalt.err (!%p660_p1)
}
  0x23   :  { %20 = dma.hbm_to_vmem [thread:$0]  %s860_s0, 128, %s18_s27, [#allocation3]  }
  0x24   :  { %s664_s14 = scalar_lea.hbm %s862_s2, 128 }
  0x25   :  { %p665_p2 = scmp.ne.s32.totalorder %s862_s2, %s664_s14  ;;  %p668_p3 = scmp.lt.u32.totalorder %s664_s14, %s862_s2 }
  0x27   :  { %p670_p4 = pnand %p668_p3, %p665_p2 }
  0x29   :  { %673 = shalt.err (!%p670_p4)
}
  0x2a   :  { %s674_s19 = scalar_lea.vmem %s40_s29, 128  ;;  %p679_p6 = scmp.lt.s32.totalorder %s40_s29, %s40_s29 }
  0x2b   :  { %p675_p5 = scmp.ne.s32.totalorder %s40_s29, %s674_s19  ;;  %p680_p7 = scmp.lt.s32.totalorder %s674_s19, %s674_s19 }
  0x2d   :  { %p681_p8 = por %p680_p7, %p679_p6 }
  0x2f   :  { %p682_p9 = pnand %p681_p8, %p675_p5 }
  0x31   :  { %685 = shalt.err (!%p682_p9)
}
  0x32   :  { %42 = dma.hbm_to_vmem [thread:$0]  %s862_s2, 128, %s40_s29, [#allocation6]  }
  0x33   :  { %708 = dma.done.wait [#allocation3], 128  }
  0x34   :  { %709 = vsyncadd [#allocation3], 4294967168 }
  0x35   :  { %710 = dma.done.wait [#allocation6], 1536  }
  0x36   :  { %711 = vsyncadd [#allocation6], 4294965760  ;;  %v719_v0 = vmov 64   ;;  %v785_v1 = vld [vmem:[#allocation2] sm:$0xff]  ;;  %v593_v3 = vld [vmem:[#allocation5] sm:$0xff]   ;;  %v720_v4 = vmov 0.0   ;;  %v61_v7 = vlaneseq }
  0x37   :  { %592 = vset.pattern.permute.xlu0 %v719_v0  ;;  %v55_v2 = vmul.f32 6.2831855, %v785_v1  ;;  %535 = vmatprep.subr.bf16.mxu0 %v720_v4  ;;  %vm721_vm0 = vmmov 0   ;;  %v594_v5 = vld [vmem:[#allocation5 + $0x8] sm:$0xff]   ;;  %v595_v6 = vld [vmem:[#allocation5 + $0x10] sm:$0xff]   ;;  %v800_v10 = vld [vmem:[#allocation7] sm:$0xff] }
  0x38   :  { %541 = vmatprep.mubr.msk.bf16.mxu0 %vm721_vm0, %v720_v4  ;;  %536 = vmatpush3.bf16.msra.mxu0 %v593_v3  ;;  %v797_v8 = vshrl.u32 %v61_v7, 7  ;;  %v722_v27 = vmov 683565275   ;;  %v723_v29 = vmov 2475754826   ;;  %vm205_vm14 = vcmask 392192  }
  0x39   :  { %58 = vperm.xlu0 %592, %v55_v2   ;;  %545 = vmatprep.subr.bf16.mxu1 %v720_v4  ;;  %v724_v32 = vmov 2131351028   ;;  %v725_v35 = vmov 2102212464   ;;  %v726_v38 = vmov 920167782  }
  0x3a   :  { %537 = vmatprep.subr.bf16.mxu0 %v720_v4  ;;  %553 = vmatprep.mubr.msk.bf16.mxu1 %vm721_vm0, %v720_v4  ;;  %v63_v9 = vsub.s32 0, %v797_v8  ;;  %v68_v11 = vsub.s32 1, %v797_v8  ;;  %v727_v41 = vmov 1326507024   ;;  %vm294_vm15 = vcmask 523264   ;;  %s728_s2 = smov [#allocation8]  }
  0x3b   :  { %s488_s21 = sshll.u32 %s728_s2, 4  ;;  %s489_s21 = int_to_ptr.vmem [resolvable:$true] %s488_s21 }
  0x3c   :  { %538 = vmatpush3.bf16.msra.mxu0 %v594_v5  ;;  %v64_v12 = vrot.slane %v800_v10, %v63_v9  ;;  %v69_v13 = vrot.slane %v800_v10, %v68_v11  ;;  %s686_s22 = scalar_lea.vmem %s489_s21, 128  ;;  %p691_p11 = scmp.lt.s32.totalorder %s489_s21, %s489_s21 }
  0x3d   :  { %539 = vmatprep.subr.bf16.mxu0 %v720_v4  ;;  %p687_p10 = scmp.ne.s32.totalorder %s489_s21, %s686_s22  ;;  %p692_p12 = scmp.lt.s32.totalorder %s686_s22, %s686_s22 }
  0x3f   :  { %p693_p13 = por %p692_p12, %p691_p11 }
  0x40   :  { %540 = vmatpush3.bf16.msra.mxu0 %v595_v6 }
  0x41   :  { %557 = vmatprep.subr.bf16.mxu0 %v720_v4  ;;  %p694_p0 = pnand %p693_p13, %p687_p10 }
  0xb8   :  { %v59_v14 = vpop.permute.xlu0 %58 }
  0xb9   :  { %v65_v15 = vmul.f32 %v64_v12, %v59_v14 }
  0xbb   :  { %v805_v16 = vadd.f32 %v69_v13, %v65_v15 }
  0xbd   :  { %v74_v17 = vand.u32 2139095040, %v805_v16  ;;  %v71_v21 = vand.u32 2147483647, %v805_v16  ;;  %vm73_vm8 = vcmp.lt.s32.totalorder %v805_v16, 0  ;;  %vm163_vm13 = vweird.f32 %v805_v16 }
  0xbf   :  { %v75_v18 = vshrl.u32 %v74_v17, 23  ;;  %v78_v24 = vand.u32 8388607, %v71_v21  ;;  %vm72_vm9 = vcmp.le.f32.partialorder %v71_v21, 0.7853982 }
  0xc1   :  { %v498_v19 = vadd.s32 4294967169, %v75_v18  ;;  %v79_v43 = vor.u32 8388608, %v78_v24 }
  0xc3   :  { %v81_v20 = vadd.s32 1, %v498_v19  ;;  %v119_v57 = vshll.u32 %v79_v43, 8 }
  0xc5   :  { %vm82_vm1 = vcmp.gt.s32.totalorder %v81_v20, 0 }
  0xc6   :  { %v83_v22 = vsel %vm82_vm1, %v81_v20, 0 }
  0xc7   :  { %v85_v23 = vand.u32 31, %v83_v22  ;;  %v84_v26 = vshrl.u32 %v83_v22, 5 }
  0xc9   :  { %v86_v25 = vsub.s32 32, %v85_v23  ;;  %v88_v28 = vshll.u32 %v722_v27, %v85_v23  ;;  %v91_v30 = vshll.u32 %v723_v29, %v85_v23  ;;  %v94_v34 = vshll.u32 %v724_v32, %v85_v23 }
  0xca   :  { %v97_v37 = vshll.u32 %v725_v35, %v85_v23  ;;  %v100_v40 = vshll.u32 %v726_v38, %v85_v23  ;;  %vm103_vm2 = vcmp.lt.s32.totalorder %v84_v26, 1  ;;  %vm106_vm3 = vcmp.lt.s32.totalorder %v84_v26, 4 }
  0xcb   :  { %v89_v31 = vshrl.u32 %v723_v29, %v86_v25  ;;  %v92_v33 = vshrl.u32 %v724_v32, %v86_v25  ;;  %v95_v36 = vshrl.u32 %v725_v35, %v86_v25  ;;  %v98_v39 = vshrl.u32 %v726_v38, %v86_v25 }
  0xcc   :  { %v101_v42 = vshrl.u32 %v727_v41, %v86_v25  ;;  %v87_v52 = vshrl.u32 %v722_v27, %v86_v25  ;;  %vm105_vm4 = vcmp.lt.s32.totalorder %v84_v26, 3  ;;  %vm104_vm5 = vcmp.lt.s32.totalorder %v84_v26, 2 }
  0xcd   :  { %v90_v44 = vor.u32 %v89_v31, %v88_v28  ;;  %v93_v45 = vor.u32 %v92_v33, %v91_v30  ;;  %v96_v46 = vor.u32 %v95_v36, %v94_v34  ;;  %v99_v47 = vor.u32 %v98_v39, %v97_v37 }
  0xce   :  { %v102_v48 = vor.u32 %v101_v42, %v100_v40 }
  0xcf   :  { %v108_v49 = vsel %vm106_vm3, %v96_v46, 2102212464  ;;  %v111_v50 = vsel %vm103_vm2, %v90_v44, %v93_v45  ;;  %v115_v51 = vsel %vm103_vm2, %v93_v45, %v96_v46  ;;  %v112_v53 = vsel %vm106_vm3, %v99_v47, 920167782 }
  0xd0   :  { %v116_v54 = vsel %vm106_vm3, %v102_v48, 1326507024  ;;  %v113_v55 = vsel %vm105_vm4, %v96_v46, %v112_v53  ;;  %v107_v58 = vsel %vm103_vm2, %v87_v52, %v90_v44  ;;  %v109_v59 = vsel %vm105_vm4, %v93_v45, %v108_v49  ;;  %v597_v52 = vld [vmem:[#allocation5 + $0x20] sm:$0xff]   ;;  %v598_v53 = vld [vmem:[#allocation5 + $0x28] sm:$0xff]  }
  0xd1   :  { %v117_v56 = vsel %vm105_vm4, %v99_v47, %v116_v54  ;;  %v114_v60 = vsel %vm104_vm5, %v111_v50, %v113_v55  ;;  %v110_v3 = vsel %vm104_vm5, %v107_v58, %v109_v59  ;;  %v185_v54 = vsub.s32 2, %v797_v8 }
  0xd2   :  { %v118_v61 = vsel %vm104_vm5, %v115_v51, %v117_v56  ;;  %v814_v0 = vmul.u32.u64.low %v119_v57, %v114_v60  ;;  %v815_v2 = vmul.u32.u64.high %v119_v57, %v114_v60, %v814_v0  ;;  %v126_v6 = vmul.u32 %v119_v57, %v110_v3  ;;  %v596_v51 = vld [vmem:[#allocation5 + $0x18] sm:$0xff]  }
  0xd3   :  { %v811_v62 = vmul.u32.u64.low %v119_v57, %v118_v61  ;;  %v812_v63 = vmul.u32.u64.high %v119_v57, %v118_v61, %v811_v62  ;;  %546 = vmatpush3.bf16.msra.mxu1 %v596_v51  ;;  %v186_v55 = vrot.slane %v800_v10, %v185_v54 }
  0xd4   :  { %v129_v5 = vadd.s32 1, %v815_v2  ;;  %547 = vmatprep.subr.bf16.mxu1 %v720_v4 }
  0xd5   :  { %vm128_vm6 = vc.u32 %v812_v63, %v814_v0  ;;  %v127_v22 = vadd.s32 %v814_v0, %v812_v63 }
  0xd6   :  { %v130_v7 = vsel %vm128_vm6, %v129_v5, %v815_v2 }
  0xd7   :  { %v131_v9 = vadd.s32 %v130_v7, %v126_v6  ;;  %548 = vmatpush3.bf16.msra.mxu1 %v597_v52  ;;  %v600_v6 = vld [vmem:[#allocation5 + $0x38] sm:$0xff]   ;;  %v601_v7 = vld [vmem:[#allocation5 + $0x40] sm:$0xff]  }
  0xd8   :  { %549 = vmatprep.subr.bf16.mxu1 %v720_v4 }
  0xd9   :  { %v132_v11 = vadd.s32 536870912, %v131_v9 }
  0xdb   :  { %v133_v12 = vshrl.u32 %v132_v11, 30  ;;  %550 = vmatpush3.bf16.msra.mxu1 %v598_v53 }
  0xdc   :  { %551 = vmatprep.subr.bf16.mxu1 %v720_v4 }
  0xdd   :  { %v134_v13 = vshll.u32 %v133_v12, 30  ;;  %v157_v34 = vsub.s32 4, %v133_v12 }
  0xdf   :  { %v135_v14 = vsub.s32 %v131_v9, %v134_v13  ;;  %v158_v37 = vsel %vm73_vm8, %v157_v34, %v133_v12  ;;  %v268_v9 = vsub.s32 3, %v797_v8 }
  0xe0   :  { %v160_v39 = vsel %vm72_vm9, 0, %v158_v37 }
  0xe1   :  { %v137_v15 = vsub.s32 0, %v135_v14  ;;  %v164_v40 = vadd.s32 3, %v160_v39  ;;  %v269_v11 = vrot.slane %v800_v10, %v268_v9 }
  0xe3   :  { %v499_v17 = vmin.u32 %v137_v15, %v135_v14  ;;  %v165_v41 = vand.u32 3, %v164_v40 }
  0xe5   :  { %v139_v18 = vclz %v499_v17  ;;  %vm170_vm10 = vcmp.eq.s32.totalorder %v165_v41, 2  ;;  %vm167_vm11 = vcmp.eq.s32.totalorder %v165_v41, 0  ;;  %vm166_vm12 = vcmp.lt.s32.totalorder %v165_v41, 2 }
  0xe7   :  { %v500_v19 = vadd.s32 4294967294, %v139_v18 }
  0xe9   :  { %vm501_vm7 = vcmp.lt.s32.totalorder %v500_v19, 0 }
  0xea   :  { %v142_v20 = vsel %vm501_vm7, 0, %v500_v19 }
  0xeb   :  { %v143_v23 = vsub.s32 32, %v142_v20  ;;  %v147_v24 = vsub.s32 4294967266, %v142_v20  ;;  %v144_v25 = vshll.u32 %v135_v14, %v142_v20 }
  0xed   :  { %v145_v26 = vshrl.u32 %v127_v22, %v143_v23  ;;  %v148_v27 = vadd.s32 127, %v147_v24  ;;  %v602_v24 = vld [vmem:[#allocation5 + $0x48] sm:$0xff]  }
  0xef   :  { %v146_v28 = vor.u32 %v145_v26, %v144_v25  ;;  %v149_v29 = vshll.u32 %v148_v27, 23  ;;  %v603_v25 = vld [vmem:[#allocation5 + $0x50] sm:$0xff]   ;;  %v352_v26 = vsub.s32 4, %v797_v8 }
  0xf1   :  { %v150_v30 = vor.u32 4788187, %v149_v29  ;;  %v153_v32 = vcvt.s32.f32 %v146_v28  ;;  %v353_v27 = vrot.slane %v800_v10, %v352_v26 }
  0xf3   :  { %v151_v31 = vand.u32 2147483647, %v150_v30 }
  0xf5   :  { %v154_v33 = vmul.f32 %v153_v32, %v151_v31 }
  0xf7   :  { %v155_v35 = vxor.u32 2147483648, %v154_v33 }
  0xf9   :  { %v156_v36 = vsel %vm73_vm8, %v155_v35, %v154_v33 }
  0xfa   :  { %v159_v38 = vsel %vm72_vm9, %v805_v16, %v156_v36  ;;  %v599_v16 = vld [vmem:[#allocation5 + $0x30] sm:$0xff]  }
  0xfb   :  { %604 = vcosq.f32 %v159_v38  ;;  %552 = vmatpush3.bf16.msra.mxu1 %v599_v16 }
  0xfc   :  { %606 = vsinq.f32 %v159_v38  ;;  %565 = vmatprep.subr.bf16.mxu1 %v720_v4 }
 0x105   :  { %v605_v42 = vpop.eup %604 }
 0x106   :  { %v607_v43 = vpop.eup %606  ;;  %v171_v44 = vxor.u32 2147483648, %v605_v42 }
 0x107   :  { %v168_v45 = vxor.u32 2147483648, %v607_v43 }
 0x108   :  { %v172_v46 = vsel %vm170_vm10, %v171_v44, %v607_v43 }
 0x109   :  { %v169_v47 = vsel %vm167_vm11, %v605_v42, %v168_v45 }
 0x10a   :  { %v173_v21 = vsel %vm166_vm12, %v169_v47, %v172_v46 }
 0x10b   :  { %v174_v48 = vsel %vm163_vm13, nan, %v173_v21 }
 0x10c   :  { %v175_v49 = vadd.f32 %v174_v48, %v785_v1 }
 0x10e   :  { %v182_v50 = vpack.c.bf16 %v175_v49, %v175_v49 }
 0x110   :  { %542 = vmatmul.mubr.msk.bf16.vlgmr.msra.gmra.mrb[0].mxu0 %vm205_vm14, %v182_v50 }
 0x111   :  { %561 = vmatprep.mubr.msk.bf16.mxu0 %vm721_vm0, %v720_v4  ;;  %558 = vmatpush3.bf16.msra.mxu0 %v600_v6 }
 0x112   :  { %559 = vmatprep.subr.bf16.mxu0 %v720_v4 }
 0x115   :  { %560 = vmatpush3.bf16.msra.mxu0 %v601_v7 }
 0x1e3   :  { %v243_v56 = vpop.f32.mrb[0].mxu0 }
 0x1e4   :  { %v244_v57 = vadd.f32 %v243_v56, %v186_v55  ;;  %v543_v58 = vpop.f32.mrb[1].mxu0 }
 0x1e5   :  { %v246_v59 = vpop.f32.mrb[2].mxu0 }
 0x1e6   :  { %v506_v60 = vmul.f32 -1.442695, %v244_v57  ;;  %v544_v61 = vpop.f32.mrb[3].mxu0 }
 0x1e8   :  { %608 = vpow2.f32 %v506_v60 }
 0x1f2   :  { %v609_v62 = vpop.eup %608 }
 0x1f3   :  { %v252_v63 = vadd.f32 1.0, %v609_v62 }
 0x1f5   :  { %610 = vrcp.f32 %v252_v63 }
 0x1ff   :  { %v611_v0 = vpop.eup %610 }
 0x200   :  { %v255_v2 = vmul.f32 %v611_v0, %v244_v57 }
 0x202   :  { %v256_v3 = vadd.f32 %v255_v2, %v785_v1 }
 0x204   :  { %v265_v5 = vpack.c.bf16 %v256_v3, %v256_v3 }
 0x206   :  { %554 = vmatmul.mubr.msk.bf16.vlgmr.msra.gmra.mrb[0].mxu1 %vm294_vm15, %v265_v5 }
 0x207   :  { %569 = vmatprep.mubr.msk.bf16.mxu1 %vm721_vm0, %v720_v4  ;;  %vm366_vm0 = vcmask 261120   ;;  %566 = vmatpush3.bf16.msra.mxu1 %v602_v24 }
 0x208   :  { %567 = vmatprep.subr.bf16.mxu1 %v720_v4  ;;  %v424_v4 = vsub.s32 5, %v797_v8 }
 0x20a   :  { %v425_v39 = vrot.slane %v800_v10, %v424_v4 }
 0x20b   :  { %568 = vmatpush3.bf16.msra.mxu1 %v603_v25 }
 0x2d9   :  { %v332_v12 = vpop.f32.mrb[0].mxu1 }
 0x2da   :  { %v333_v13 = vadd.f32 %v332_v12, %v269_v11  ;;  %v555_v14 = vpop.f32.mrb[1].mxu1 }
 0x2db   :  { %v335_v1 = vpop.f32.mrb[2].mxu1 }
 0x2dc   :  { %v512_v15 = vmul.f32 -1.442695, %v333_v13  ;;  %v556_v17 = vpop.f32.mrb[3].mxu1 }
 0x2de   :  { %612 = vpow2.f32 %v512_v15 }
 0x2e8   :  { %v613_v18 = vpop.eup %612 }
 0x2e9   :  { %v341_v19 = vadd.f32 1.0, %v613_v18 }
 0x2eb   :  { %614 = vrcp.f32 %v341_v19 }
 0x2f5   :  { %v615_v20 = vpop.eup %614 }
 0x2f6   :  { %v344_v22 = vmul.f32 %v615_v20, %v333_v13 }
 0x2f8   :  { %v349_v23 = vpack.c.bf16 %v344_v22, %v344_v22 }
 0x2fa   :  { %562 = vmatmul.mubr.msk.bf16.vlgmr.msra.gmra.mrb[4].mxu0 %vm366_vm0, %v349_v23 }
 0x3cd   :  { %v404_v28 = vpop.f32.mrb[4].mxu0 }
 0x3ce   :  { %v405_v29 = vadd.f32 %v404_v28, %v353_v27  ;;  %v563_v30 = vpop.f32.mrb[5].mxu0 }
 0x3cf   :  { %v407_v31 = vpop.f32.mrb[6].mxu0 }
 0x3d0   :  { %v516_v32 = vmul.f32 -1.442695, %v405_v29  ;;  %v564_v33 = vpop.f32.mrb[7].mxu0 }
 0x3d2   :  { %616 = vpow2.f32 %v516_v32 }
 0x3dc   :  { %v617_v34 = vpop.eup %616 }
 0x3dd   :  { %v413_v35 = vadd.f32 1.0, %v617_v34 }
 0x3df   :  { %618 = vrcp.f32 %v413_v35 }
 0x3e9   :  { %v619_v36 = vpop.eup %618 }
 0x3ea   :  { %v416_v37 = vmul.f32 %v619_v36, %v405_v29 }
 0x3ec   :  { %v421_v38 = vpack.c.bf16 %v416_v37, %v416_v37 }
 0x3ee   :  { %570 = vmatmul.mubr.msk.bf16.vlgmr.msra.gmra.mrb[4].mxu1 %vm366_vm0, %v421_v38 }
 0x4c1   :  { %v475_v40 = vpop.f32.mrb[4].mxu1 }
 0x4c2   :  { %v476_v41 = vadd.f32 %v475_v40, %v425_v39  ;;  %v571_v42 = vpop.f32.mrb[5].mxu1 }
 0x4c3   :  { %v478_v43 = vpop.f32.mrb[6].mxu1 }
 0x4c4   :  { %481 = vst [vmem:[#allocation8] sm:$0xff] %v476_v41  ;;  %v572_v44 = vpop.f32.mrb[7].mxu1 }
 0x4c5   :  { %697 = shalt.err (!%p694_p0)
}
 0x4c6   :  { %s698_s25 = scalar_lea.hbm %s863_s3, 128 }
 0x4c7   :  { %p699_p1 = scmp.ne.s32.totalorder %s863_s3, %s698_s25  ;;  %p702_p2 = scmp.lt.u32.totalorder %s698_s25, %s863_s3 }
 0x4c9   :  { %p704_p3 = pnand %p702_p2, %p699_p1 }
 0x4cb   :  { %707 = shalt.err (!%p704_p3)
}
 0x4cc   :  { %491 = dma.vmem_to_hbm [thread:$0]  %s489_s21, 128, %s863_s3, [#allocation4]  }
 0x4cd   :  { %712 = dma.done.wait [#allocation4], 128  }
 0x4ce   :  { %713 = vsyncadd [#allocation4], 4294967168 }
 0x4cf   :  { %495 = vsyncpa [#allocation3], 1 }
 0x4d0   :  { %496 = vsyncpa [#allocation6], 1 }
 0x4d1   :  { %497 = vsyncpa [#allocation4], 1 }

</bundles_post_ra>
